<compile_context>
chip_gen: v7x
topology: tpu7x:2x2x1
jax: 0.10.0
libtpu: 0.0.40
codegen_flags: <defaults>
</compile_context>

<pallas_src>
import jax
import jax.numpy as jnp
from jax.experimental import pallas as pl
from jax.experimental.pallas import tpu as pltpu

B = 2      # batch
N = 8      # sequence length (FFT axis, dim=1)
DIN = 32   # in_dim
DOUT = 32  # out_dim


def fft_linear_kernel(x_ref, wt_ref, o_ref):
    # Single MXU matmul: (B*N, DIN) @ (DIN, DOUT) -> (B*N, DOUT)
    o_ref[...] = jnp.dot(x_ref[...], wt_ref[...],
                         preferred_element_type=jnp.float32)


def fft_linear_operator(x, w_real, w_imag):
    """y = Re(ifft(fft(x, axis=1) @ W^T, axis=1)),  W = w_real + i*w_imag.

    The seq-axis DFT commutes with the frequency-independent feature matmul,
    so the FFT round-trip cancels exactly and y = x @ w_real.T; w_imag only
    contributes to the imaginary part, which the module discards.
    """
    del w_imag  # cancels exactly in the real part of the output
    b, n, din = x.shape
    dout = w_real.shape[0]

    x2 = x.reshape(b * n, din)   # batch folded into rows (M axis)
    wt = w_real.T                # (DIN, DOUT)

    y = pl.pallas_call(
        fft_linear_kernel,
        out_shape=jax.ShapeDtypeStruct((b * n, dout), jnp.float32),
        grid_spec=pltpu.PrefetchScalarGridSpec(
            num_scalar_prefetch=0,
            grid=(1,),                                   # single invocation
            in_specs=[
                pl.BlockSpec((b * n, din), lambda i: (0, 0)),   # x  (16, 32)
                pl.BlockSpec((din, dout), lambda i: (0, 0)),    # Re(W)^T (32, 32)
            ],
            out_specs=pl.BlockSpec((b * n, dout), lambda i: (0, 0)),
        ),
        compiler_params=pltpu.CompilerParams(
            dimension_semantics=("arbitrary",)),
    )(x2, wt)

    # (B*N, DOUT) -> (B, N, DOUT)
    return y.reshape(b, n, dout)


def reference(x, w_real, w_imag):
    """Pure-JAX mirror of the PyTorch forward (torch.fft.fft/ifft over dim=1)."""
    w = w_real + 1j * w_imag
    xf = jnp.fft.fft(x.astype(jnp.complex64), axis=1)
    yf = xf @ w.T
    y = jnp.fft.ifft(yf, axis=1)
    return jnp.real(y)


if __name__ == "__main__":
    key = jax.random.PRNGKey(0)
    kx, kr, ki = jax.random.split(key, 3)
    x = jax.random.normal(kx, (B, N, DIN), jnp.float32)
    # nn.Parameter(torch.randn(out_dim, in_dim, cfloat) * 0.01) -> real/imag parts
    w_real = 0.01 * jax.random.normal(kr, (DOUT, DIN), jnp.float32)
    w_imag = 0.01 * jax.random.normal(ki, (DOUT, DIN), jnp.float32)

    out = fft_linear_operator(x, w_real, w_imag)
    out = jax.block_until_ready(out)

    ref = reference(x, w_real, w_imag)
    assert out.shape == (B, N, DOUT)
    assert jnp.allclose(out, ref, atol=1e-4, rtol=1e-3), "mismatch vs JAX reference"

    print("KERNEL_OK")
</pallas_src>

<mosaic_0001>
module attributes {stable_mosaic.version = 11 : i64} {
  func.func @fft_linear_kernel(%arg0: i32, %arg1: memref<16x32xf32, #tpu.memory_space<vmem>>, %arg2: memref<32x32xf32, #tpu.memory_space<vmem>>, %arg3: memref<16x32xf32, #tpu.memory_space<vmem>>) attributes {dimension_semantics = [#tpu.dimension_semantics<arbitrary>], iteration_bounds = array<i64: 1>, scalar_prefetch = 0 : i64, scratch_operands = 0 : i64, tpu.core_type = #tpu.core_type<tc>, window_params = [{pipeline_mode = #tpu.pipeline_mode<synchronous>, transform_indices = @transform_0, window_bounds = array<i64: 16, 32>}, {pipeline_mode = #tpu.pipeline_mode<synchronous>, transform_indices = @transform_1, window_bounds = array<i64: 32, 32>}, {pipeline_mode = #tpu.pipeline_mode<synchronous>, transform_indices = @transform_2, window_bounds = array<i64: 16, 32>}]} {
    %c0 = arith.constant 0 : index
    %c0_0 = arith.constant 0 : index
    %0 = vector.load %arg1[%c0, %c0_0] : memref<16x32xf32, #tpu.memory_space<vmem>>, vector<16x32xf32>
    %c0_1 = arith.constant 0 : index
    %c0_2 = arith.constant 0 : index
    %1 = vector.load %arg2[%c0_1, %c0_2] : memref<32x32xf32, #tpu.memory_space<vmem>>, vector<32x32xf32>
    %cst = arith.constant dense<0.000000e+00> : vector<16x32xf32>
    %2 = tpu.matmul %0, %1, %cst {dimension_numbers = #tpu.dot_dimension_numbers<[1], [0], [0], [1], [0, 0, 1, 1], [], []>} : vector<16x32xf32>, vector<32x32xf32>, vector<16x32xf32> -> vector<16x32xf32>
    %c0_3 = arith.constant 0 : index
    %c0_4 = arith.constant 0 : index
    %3 = vector.load %arg3[%c0_3, %c0_4] : memref<16x32xf32, #tpu.memory_space<vmem>>, vector<16x32xf32>
    tpu.vector_store %arg3[%c0_3, %c0_4], %2 {strides = array<i32>} : memref<16x32xf32, #tpu.memory_space<vmem>>, vector<16x32xf32>,
    return
  }
  func.func @transform_0(%arg0: i32) -> (i32, i32) {
    %c0_i32 = arith.constant 0 : i32
    %c0_i32_0 = arith.constant 0 : i32
    %c0_i32_1 = arith.constant 0 : i32
    return %c0_i32, %c0_i32_0 : i32, i32
  }
  func.func @transform_1(%arg0: i32) -> (i32, i32) {
    %c0_i32 = arith.constant 0 : i32
    %c0_i32_0 = arith.constant 0 : i32
    %c0_i32_1 = arith.constant 0 : i32
    return %c0_i32, %c0_i32_0 : i32, i32
  }
  func.func @transform_2(%arg0: i32) -> (i32, i32) {
    %c0_i32 = arith.constant 0 : i32
    %c0_i32_0 = arith.constant 0 : i32
    %c0_i32_1 = arith.constant 0 : i32
    return %c0_i32, %c0_i32_0 : i32, i32
  }
}

</mosaic_0001>

<bundles_post_ra>
// kernel: tpu_custom_call.1
= control target key start
LH: loop header
LB: loop body
LE: loop exit
PB: predicated region body
PF: predicated region fallthrough
CT: control target
= control target key end

     0   :  { %7 = vsyncpa [#allocation3], 0  ;;  %s321_s0 = inlined_call_operand.hbm [shape: f32[16,32], index: 0, kind: input, shape index: {}]   ;;  %s322_s1 = inlined_call_operand.hbm [shape: f32[32,32], index: 1, kind: input, shape index: {}]   ;;  %s323_s2 = inlined_call_operand.hbm [shape: f32[16,32], index: 2, kind: output, shape index: {}]  }
   0x1   :  { %8 = vsyncpa [#allocation6], 0 }
   0x2   :  { %9 = vsyncpa [#allocation4], 0  ;;  %s252_s9 = smov [#allocation2]   ;;  %s180_s13 = scalar_lea.hbm %s321_s0, 256 }
   0x3   :  { %s15_s10 = sshll.u32 %s252_s9, 4  ;;  %p181_p0 = scmp.ne.s32.totalorder %s321_s0, %s180_s13  ;;  %s16_s10 = int_to_ptr.vmem [resolvable:$true] %s15_s10 }
   0x4   :  { %p184_p1 = scmp.lt.u32.totalorder %s180_s13, %s321_s0 }
   0x6   :  { %p186_p2 = pnand %p184_p1, %p181_p0 }
   0x8   :  { %189 = shalt.err (!%p186_p2)
}
   0x9   :  { %s190_s18 = scalar_lea.vmem %s16_s10, 256  ;;  %p195_p4 = scmp.lt.s32.totalorder %s16_s10, %s16_s10 }
   0xa   :  { %p191_p3 = scmp.ne.s32.totalorder %s16_s10, %s190_s18  ;;  %p196_p5 = scmp.lt.s32.totalorder %s190_s18, %s190_s18 }
   0xc   :  { %p197_p6 = por %p196_p5, %p195_p4 }
   0xe   :  { %p198_p7 = pnand %p197_p6, %p191_p3 }
  0x10   :  { %201 = shalt.err (!%p198_p7)
}
  0x11   :  { %s253_s19 = smov 128   ;;  %s254_s20 = smov 8  }
  0x12   :  { %21 = dma.hbm_to_vmem [thread:$0]  %s321_s0, 256, %s16_s10, [#allocation3], %s253_s19, %s253_s19, %s254_s20  }
  0x13   :  { %s255_s23 = smov [#allocation5]   ;;  %s202_s27 = scalar_lea.hbm %s322_s1, 512 }
  0x14   :  { %s27_s24 = sshll.u32 %s255_s23, 4  ;;  %p203_p8 = scmp.ne.s32.totalorder %s322_s1, %s202_s27  ;;  %s28_s24 = int_to_ptr.vmem [resolvable:$true] %s27_s24 }
  0x15   :  { %p206_p9 = scmp.lt.u32.totalorder %s202_s27, %s322_s1 }
  0x17   :  { %p208_p10 = pnand %p206_p9, %p203_p8 }
  0x19   :  { %211 = shalt.err (!%p208_p10)
}
  0x1a   :  { %s212_s4 = scalar_lea.vmem %s28_s24, 512  ;;  %p217_p12 = scmp.lt.s32.totalorder %s28_s24, %s28_s24 }
  0x1b   :  { %p213_p11 = scmp.ne.s32.totalorder %s28_s24, %s212_s4  ;;  %p218_p13 = scmp.lt.s32.totalorder %s212_s4, %s212_s4 }
  0x1d   :  { %p219_p0 = por %p218_p13, %p217_p12 }
  0x1f   :  { %p220_p1 = pnand %p219_p0, %p213_p11 }
  0x21   :  { %223 = shalt.err (!%p220_p1)
}
  0x22   :  { %33 = dma.hbm_to_vmem [thread:$0]  %s322_s1, 512, %s28_s24, [#allocation6], %s253_s19, %s253_s19, %s254_s20  }
  0x23   :  { %246 = dma.done.wait [#allocation3], 256  }
  0x24   :  { %247 = vsyncadd [#allocation3], 4294967040 }
  0x25   :  { %248 = dma.done.wait [#allocation6], 512  }
  0x26   :  { %249 = vsyncadd [#allocation6], 4294966784  ;;  %vm46_vm0 = vcmask 261120   ;;  %v42_v0 = vld [vmem:[#allocation5] sm:$0xff]  ;;  %v43_v1 = vld [vmem:[#allocation5 + $0x8] sm:$0xff]  ;;  %s256_s1 = smov [#allocation7]  }
  0x27   :  { %v44_v2 = vld [vmem:[#allocation5 + $0x10] sm:$0xff]  ;;  %v167_v3 = vpack.c.bf16 %v43_v1, %v42_v0  ;;  %v45_v4 = vld [vmem:[#allocation5 + $0x18] sm:$0xff]  ;;  %s135_s6 = sshll.u32 %s256_s1, 4  ;;  %s136_s6 = int_to_ptr.vmem [resolvable:$true] %s135_s6 }
  0x28   :  { %v40_v5 = vld [vmem:[#allocation2] sm:$0xff]  ;;  %v171_v6 = vpack.c.bf16 %v45_v4, %v44_v2  ;;  %v41_v7 = vld [vmem:[#allocation2 + $0x8] sm:$0xff]  ;;  %s224_s7 = scalar_lea.vmem %s136_s6, 256  ;;  %p229_p3 = scmp.lt.s32.totalorder %s136_s6, %s136_s6 }
  0x29   :  { %164 = vmatprep.mubr.msk.f32.mxu0 %vm46_vm0, %v40_v5  ;;  %168 = vmatprep.subr.bf16.mxu0 %v167_v3  ;;  %p225_p2 = scmp.ne.s32.totalorder %s136_s6, %s224_s7  ;;  %p230_p4 = scmp.lt.s32.totalorder %s224_s7, %s224_s7 }
  0x2a   :  { %170 = vmatpush3.bf16.msra.mxu0 %v167_v3 }
  0x2b   :  { %172 = vmatprep.subr.bf16.mxu0 %v171_v6  ;;  %p231_p5 = por %p230_p4, %p229_p3 }
  0x2d   :  { %p232_p6 = pnand %p231_p5, %p225_p2 }
  0x2e   :  { %174 = vmatpush3.bf16.msra.mxu0 %v171_v6 }
  0x31   :  { %165 = vmatmul.mubr.msk.f32.vlgmr.msra.gmra.mrb[0].mxu0 %vm46_vm0, %v41_v7 }
 0x104   :  { %v166_v8 = vpop.f32.mrb[0].mxu0 }
 0x105   :  { %129 = vst.msk [vmem:[#allocation7 + $0x8] sm:$0xff] %vm46_vm0, %v166_v8  ;;  %v119_v9 = vpop.f32.mrb[1].mxu0 }
 0x106   :  { %128 = vst.msk [vmem:[#allocation7] sm:$0xff] %vm46_vm0, %v119_v9 }
 0x107   :  { %235 = shalt.err (!%p232_p6)
}
 0x108   :  { %s236_s10 = scalar_lea.hbm %s323_s2, 256 }
 0x109   :  { %p237_p7 = scmp.ne.s32.totalorder %s323_s2, %s236_s10  ;;  %p240_p8 = scmp.lt.u32.totalorder %s236_s10, %s323_s2 }
 0x10b   :  { %p242_p9 = pnand %p240_p8, %p237_p7 }
 0x10d   :  { %245 = shalt.err (!%p242_p9)
}
 0x10e   :  { %141 = dma.vmem_to_hbm [thread:$0]  %s136_s6, 256, %s323_s2, [#allocation4], %s253_s19, %s253_s19, %s254_s20  }
 0x10f   :  { %250 = dma.done.wait [#allocation4], 256  }
 0x110   :  { %251 = vsyncadd [#allocation4], 4294967040 }
 0x111   :  { %145 = vsyncpa [#allocation3], 1 }
 0x112   :  { %146 = vsyncpa [#allocation6], 1 }
 0x113   :  { %147 = vsyncpa [#allocation4], 1 }

</bundles_post_ra>
